<compile_context>
chip_gen: v7x
topology: tpu7x:2x2x1
jax: 0.10.0
libtpu: 0.0.40
codegen_flags: <defaults>
</compile_context>

<pallas_src>
import functools
import math

import numpy as np
import jax
import jax.numpy as jnp
from jax.experimental import pallas as pl
from jax.experimental.pallas import tpu as pltpu


def _graphconv_kernel(xT_ref, wcatT_ref, aoffT_ref, drow_ref, shiftb_ref, o_ref, *, cout):
    # xT_ref block : (Cin, TBJ)     channel-major activations (lane-dense), bf16
    # wcatT_ref    : (2*Cout, Cin)  [ (W0*bn_scale)^T ; (W1*bn_scale)^T ], bf16
    # aoffT_ref    : (TBJ, TBJ)     kron(I_TB, A_off^T) block-diag adjacency, bf16
    # drow_ref     : (1, TBJ)       softmax diagonal tiled per batch element, f32
    # shiftb_ref   : (Cout, TBJ)    (gc_bias*bn_scale + bn_shift) pre-broadcast, f32
    xt = xT_ref[...]                                                     # (Cin, TBJ)

    # Fused feature matmul for both W branches (bf16 in, f32 accumulate).
    ht = jnp.dot(wcatT_ref[...], xt, preferred_element_type=jnp.float32)  # (2Cout, TBJ)
    h0t = ht[:cout, :]                                                   # f32
    h1t = ht[cout:, :].astype(aoffT_ref.dtype)                           # back to bf16 for MXU

    # Diagonal adjacency -> elementwise per-node scale (VPU, f32).
    out = drow_ref[...] * h0t                                            # (Cout, TBJ)
    # Off-diagonal adjacency -> one wide block-diagonal GEMM over the tile (MXU).
    out = out + jnp.dot(h1t, aoffT_ref[...], preferred_element_type=jnp.float32)

    # Folded (gconv bias + BatchNorm1d eval) shift, then ReLU — all f32.
    out = out + shiftb_ref[...]
    o_ref[...] = jnp.maximum(out, 0.0).astype(o_ref.dtype)


def _pick_batch_tile(B, J, max_lanes=512, min_lanes_for_split=256):
    """Pick TB (batch elements per grid step) so TBJ=TB*J is lane-aligned,
    targets 256-512 lanes, never tiles far past the batch, and prefers >=2
    grid steps (v7x megacore) when that keeps TBJ >= 256."""
    tb0 = 128 // math.gcd(J, 128)            # minimal TB so TB*J % 128 == 0
    mult = max(1, min(max_lanes // (tb0 * J), -(-B // tb0)))
    while (mult > 1 and -(-B // (mult * tb0)) < 2
           and (mult - 1) * tb0 * J >= min_lanes_for_split):
        mult -= 1
    return tb0 * mult
    # TODO(synk): if J shares no factor with 128 (e.g. J=17), tb0*J blows past the
    #             512-lane cap; pad J up to a lane-friendly size in that case.


class GraphConvTPU:
    """_GraphConv forward (SemGraphConv + BatchNorm1d eval + ReLU) on TPU.

    All x-independent parameter preprocessing happens once in __init__; the
    per-batch-tile constants (kron'd adjacency, tiled diag, broadcast shift)
    are cached per tile size."""

    def __init__(self, adj_np, W, e, gc_bias, bn_gamma, bn_beta, bn_mean, bn_var,
                 eps=1e-5, matmul_dtype=jnp.bfloat16):
        J = adj_np.shape[0]
        self.J = J
        self.cin = int(W.shape[1])
        self.cout = int(W.shape[2])
        self.matmul_dtype = matmul_dtype

        # ---- masked softmax of adjacency logits (same nonzero order as torch) ----
        rows, cols = np.nonzero(adj_np > 0)
        logits = jnp.full((J, J), -9.0e15, jnp.float32).at[rows, cols].set(e[0])
        adj_soft = jax.nn.softmax(logits, axis=1)                 # F.softmax(adj, dim=1)
        self.d_diag = jnp.diagonal(adj_soft)                      # (J,)  == (adj * M) diag
        self.a_offT = (adj_soft * (1.0 - jnp.eye(J, dtype=jnp.float32))).T   # (J, J)

        # ---- fold BatchNorm1d (eval) and gconv bias into weights + one shift ----
        bn_scale = bn_gamma / jnp.sqrt(bn_var + eps)              # (Cout,)
        self.shift = gc_bias * bn_scale + (bn_beta - bn_mean * bn_scale)
        w0s = W[0] * bn_scale[None, :]                            # (Cin, Cout)
        w1s = W[1] * bn_scale[None, :]
        self.wcatT = jnp.concatenate([w0s.T, w1s.T], axis=0).astype(matmul_dtype)  # (2Cout, Cin)

        self._tile_cache = {}                                     # TB -> per-tile constants
        # TODO(synk): training-mode BatchNorm1d (batch statistics) not implemented; eval only.

    def _tiles(self, TB):
        if TB not in self._tile_cache:
            TBJ = TB * self.J
            aoffT_big = jnp.kron(jnp.eye(TB, dtype=jnp.float32),
                                 self.a_offT).astype(self.matmul_dtype)       # (TBJ, TBJ)
            drow = jnp.tile(self.d_diag, TB).reshape(1, TBJ).astype(jnp.float32)
            shift_b = jnp.broadcast_to(
                self.shift.reshape(self.cout, 1), (self.cout, TBJ)).astype(jnp.float32)
            self._tile_cache[TB] = (aoffT_big, drow, jnp.asarray(shift_b))
        return self._tile_cache[TB]

    def apply_channel_major(self, xT, TB):
        """Channel-major forward: (Cin, Bp*J) -> (Cout, Bp*J), Bp % TB == 0.
        Use this directly when stacking layers to avoid per-layer transposes."""
        cin, n = xT.shape
        TBJ = TB * self.J
        assert n % TBJ == 0, "padded batch must be a multiple of the batch tile"
        grid = (n // TBJ,)
        aoffT_big, drow, shift_b = self._tiles(TB)

        return pl.pallas_call(
            functools.partial(_graphconv_kernel, cout=self.cout),
            out_shape=jax.ShapeDtypeStruct((self.cout, n), jnp.float32),
            grid=grid,
            in_specs=[
                pl.BlockSpec((cin, TBJ), lambda b: (0, b)),            # x^T batch tile (streamed)
                pl.BlockSpec((2 * self.cout, cin), lambda b: (0, 0)),  # folded weights (resident)
                pl.BlockSpec((TBJ, TBJ), lambda b: (0, 0)),            # block-diag adjacency^T
                pl.BlockSpec((1, TBJ), lambda b: (0, 0)),              # diag(adj) tiled
                pl.BlockSpec((self.cout, TBJ), lambda b: (0, 0)),      # pre-broadcast shift
            ],
            out_specs=pl.BlockSpec((self.cout, TBJ), lambda b: (0, b)),
            compiler_params=pltpu.CompilerParams(
                dimension_semantics=("parallel",)),   # batch axis splits across v7x's 2 TCs
            # VMEM budget @ TBJ=512, C=128: ~1.6 MiB incl. double buffers — well under
            # every generation's default scoped limit, so no vmem_limit_bytes override.
        )(xT.astype(self.matmul_dtype), self.wcatT, aoffT_big, drow, shift_b)

    def __call__(self, x, batch_tile=None):
        """(B, J, Cin) -> (B, J, Cout).  Layout plumbing (pad/transpose) lives here,
        at the model boundary; stacked layers should use apply_channel_major."""
        B, J, cin = x.shape
        TB = int(batch_tile) if batch_tile is not None else _pick_batch_tile(B, J)
        Bp = -(-B // TB) * TB
        xp = jnp.pad(x.astype(jnp.float32), ((0, Bp - B), (0, 0), (0, 0)))
        xT = jnp.transpose(xp, (2, 0, 1)).reshape(cin, Bp * J)
        oT = self.apply_channel_major(xT, TB)
        return jnp.transpose(oT.reshape(self.cout, Bp, J), (1, 2, 0))[:B]


def _reference(x, W, e, adj_np, gc_bias, bn_gamma, bn_beta, bn_mean, bn_var, eps=1e-5):
    """Pure-JAX f32 reference mirroring the PyTorch forward (BN eval mode)."""
    J = adj_np.shape[0]
    h0 = jnp.matmul(x, W[0])
    h1 = jnp.matmul(x, W[1])
    rows, cols = np.nonzero(adj_np > 0)
    logits = jnp.full((J, J), -9.0e15, jnp.float32).at[rows, cols].set(e[0])
    adj_soft = jax.nn.softmax(logits, axis=1)
    eye = jnp.eye(J, dtype=jnp.float32)
    out = jnp.matmul(adj_soft * eye, h0) + jnp.matmul(adj_soft * (1.0 - eye), h1)
    out = out + gc_bias.reshape(1, 1, -1)
    out = (out - bn_mean) / jnp.sqrt(bn_var + eps) * bn_gamma + bn_beta
    return jnp.maximum(out, 0.0)


if __name__ == "__main__":
    J, Cin, Cout = 16, 32, 32

    key = jax.random.PRNGKey(0)
    k_x1, k_x2, k_w, k_b, k_g, k_bt, k_m, k_v = jax.random.split(key, 8)

    # deterministic adjacency: chain graph with self-loops (adj > 0 defines the mask)
    adj_np = np.zeros((J, J), np.float32)
    for i in range(J):
        for j in range(J):
            if abs(i - j) <= 1:
                adj_np[i, j] = 1.0

    # SemGraphConv parameters
    bound = float(np.sqrt(6.0 / (Cin + Cout)) * 1.414)           # xavier_uniform-style bound
    W = jax.random.uniform(k_w, (2, Cin, Cout), jnp.float32, -bound, bound)
    e = jnp.ones((1, int((adj_np > 0).sum())), jnp.float32)      # nn.init.constant_(e, 1)
    stdv = 1.0 / np.sqrt(Cout)
    gc_bias = jax.random.uniform(k_b, (Cout,), jnp.float32, -stdv, stdv)

    # BatchNorm1d parameters (inference mode, deterministic)
    bn_gamma = 1.0 + 0.1 * jax.random.normal(k_g, (Cout,), jnp.float32)
    bn_beta = 0.1 * jax.random.normal(k_bt, (Cout,), jnp.float32)
    bn_mean = 0.1 * jax.random.normal(k_m, (Cout,), jnp.float32)
    bn_var = jnp.abs(1.0 + 0.1 * jax.random.normal(k_v, (Cout,), jnp.float32))

    layer = GraphConvTPU(adj_np, W, e, gc_bias, bn_gamma, bn_beta, bn_mean, bn_var)

    # bf16 matmul operands vs f32 PyTorch-style reference -> loosened tolerance.
    TOL = dict(rtol=4e-2, atol=4e-2)

    # Case 1: tiny batch (B=2) — single grid step, TBJ=128.
    x1 = jax.random.normal(k_x1, (2, J, Cin), jnp.float32)
    out1 = jax.block_until_ready(layer(x1))
    ref1 = _reference(x1, W, e, adj_np, gc_bias, bn_gamma, bn_beta, bn_mean, bn_var)
    np.testing.assert_allclose(np.asarray(out1), np.asarray(ref1), **TOL)

    # Case 2: B=40 — exercises the fat tile (TB=32, TBJ=512), the zero-padded
    # ragged batch tail, and a 2-step grid (both v7x TensorCores active).
    x2 = jax.random.normal(k_x2, (40, J, Cin), jnp.float32)
    out2 = jax.block_until_ready(layer(x2))
    ref2 = _reference(x2, W, e, adj_np, gc_bias, bn_gamma, bn_beta, bn_mean, bn_var)
    np.testing.assert_allclose(np.asarray(out2), np.asarray(ref2), **TOL)

    print("KERNEL_OK")
</pallas_src>

<mosaic_0001>
module attributes {stable_mosaic.version = 11 : i64} {
  func.func @_graphconv_kernel(%arg0: i32, %arg1: memref<32x128xbf16, #tpu.memory_space<vmem>>, %arg2: memref<64x32xbf16, #tpu.memory_space<vmem>>, %arg3: memref<128x128xbf16, #tpu.memory_space<vmem>>, %arg4: memref<1x128xf32, #tpu.memory_space<vmem>>, %arg5: memref<32x128xf32, #tpu.memory_space<vmem>>, %arg6: memref<32x128xf32, #tpu.memory_space<vmem>>) attributes {dimension_semantics = [#tpu.dimension_semantics<parallel>], iteration_bounds = array<i64: 1>, scalar_prefetch = 0 : i64, scratch_operands = 0 : i64, tpu.core_type = #tpu.core_type<tc>, window_params = [{transform_indices = @transform_0, window_bounds = array<i64: 32, 128>}, {pipeline_mode = #tpu.pipeline_mode<synchronous>, transform_indices = @transform_1, window_bounds = array<i64: 64, 32>}, {pipeline_mode = #tpu.pipeline_mode<synchronous>, transform_indices = @transform_2, window_bounds = array<i64: 128, 128>}, {pipeline_mode = #tpu.pipeline_mode<synchronous>, transform_indices = @transform_3, window_bounds = array<i64: 1, 128>}, {pipeline_mode = #tpu.pipeline_mode<synchronous>, transform_indices = @transform_4, window_bounds = array<i64: 32, 128>}, {transform_indices = @transform_5, window_bounds = array<i64: 32, 128>}]} {
    %c0 = arith.constant 0 : index
    %c0_0 = arith.constant 0 : index
    %0 = vector.load %arg1[%c0, %c0_0] : memref<32x128xbf16, #tpu.memory_space<vmem>>, vector<32x128xbf16>
    %c0_1 = arith.constant 0 : index
    %c0_2 = arith.constant 0 : index
    %1 = vector.load %arg2[%c0_1, %c0_2] : memref<64x32xbf16, #tpu.memory_space<vmem>>, vector<64x32xbf16>
    %cst = arith.constant dense<0.000000e+00> : vector<64x128xf32>
    %2 = tpu.matmul %1, %0, %cst {dimension_numbers = #tpu.dot_dimension_numbers<[1], [0], [0], [1], [0, 0, 1, 1], [], []>} : vector<64x32xbf16>, vector<32x128xbf16>, vector<64x128xf32> -> vector<64x128xf32>
    %3 = vector.extract_strided_slice %2 {offsets = [0, 0], sizes = [32, 128], strides = [1, 1]} : vector<64x128xf32> to vector<32x128xf32>
    %4 = vector.extract_strided_slice %2 {offsets = [32, 0], sizes = [32, 128], strides = [1, 1]} : vector<64x128xf32> to vector<32x128xf32>
    %5 = arith.truncf %4 : vector<32x128xf32> to vector<32x128xbf16>
    %c0_3 = arith.constant 0 : index
    %c0_4 = arith.constant 0 : index
    %6 = vector.load %arg4[%c0_3, %c0_4] : memref<1x128xf32, #tpu.memory_space<vmem>>, vector<1x128xf32>
    %7 = vector.broadcast %6 : vector<1x128xf32> to vector<32x128xf32>
    %8 = arith.mulf %7, %3 : vector<32x128xf32>
    %c0_5 = arith.constant 0 : index
    %c0_6 = arith.constant 0 : index
    %9 = vector.load %arg3[%c0_5, %c0_6] : memref<128x128xbf16, #tpu.memory_space<vmem>>, vector<128x128xbf16>
    %cst_7 = arith.constant dense<0.000000e+00> : vector<32x128xf32>
    %10 = tpu.matmul %5, %9, %cst_7 {dimension_numbers = #tpu.dot_dimension_numbers<[1], [0], [0], [1], [0, 0, 1, 1], [], []>} : vector<32x128xbf16>, vector<128x128xbf16>, vector<32x128xf32> -> vector<32x128xf32>
    %11 = arith.addf %8, %10 : vector<32x128xf32>
    %c0_8 = arith.constant 0 : index
    %c0_9 = arith.constant 0 : index
    %12 = vector.load %arg5[%c0_8, %c0_9] : memref<32x128xf32, #tpu.memory_space<vmem>>, vector<32x128xf32>
    %13 = arith.addf %11, %12 : vector<32x128xf32>
    %cst_10 = arith.constant 0.000000e+00 : f32
    %14 = vector.broadcast %cst_10 : f32 to vector<32x128xf32>
    %15 = arith.maximumf %13, %14 : vector<32x128xf32>
    %c0_11 = arith.constant 0 : index
    %c0_12 = arith.constant 0 : index
    %16 = vector.load %arg6[%c0_11, %c0_12] : memref<32x128xf32, #tpu.memory_space<vmem>>, vector<32x128xf32>
    tpu.vector_store %arg6[%c0_11, %c0_12], %15 {strides = array<i32>} : memref<32x128xf32, #tpu.memory_space<vmem>>, vector<32x128xf32>,
    return
  }
  func.func @transform_0(%arg0: i32) -> (i32, i32) {
    %c0_i32 = arith.constant 0 : i32
    %c0_i32_0 = arith.constant 0 : i32
    return %c0_i32, %arg0 : i32, i32
  }
  func.func @transform_1(%arg0: i32) -> (i32, i32) {
    %c0_i32 = arith.constant 0 : i32
    %c0_i32_0 = arith.constant 0 : i32
    %c0_i32_1 = arith.constant 0 : i32
    return %c0_i32, %c0_i32_0 : i32, i32
  }
  func.func @transform_2(%arg0: i32) -> (i32, i32) {
    %c0_i32 = arith.constant 0 : i32
    %c0_i32_0 = arith.constant 0 : i32
    %c0_i32_1 = arith.constant 0 : i32
    return %c0_i32, %c0_i32_0 : i32, i32
  }
  func.func @transform_3(%arg0: i32) -> (i32, i32) {
    %c0_i32 = arith.constant 0 : i32
    %c0_i32_0 = arith.constant 0 : i32
    %c0_i32_1 = arith.constant 0 : i32
    return %c0_i32, %c0_i32_0 : i32, i32
  }
  func.func @transform_4(%arg0: i32) -> (i32, i32) {
    %c0_i32 = arith.constant 0 : i32
    %c0_i32_0 = arith.constant 0 : i32
    %c0_i32_1 = arith.constant 0 : i32
    return %c0_i32, %c0_i32_0 : i32, i32
  }
  func.func @transform_5(%arg0: i32) -> (i32, i32) {
    %c0_i32 = arith.constant 0 : i32
    %c0_i32_0 = arith.constant 0 : i32
    return %c0_i32, %arg0 : i32, i32
  }
}

</mosaic_0001>

<bundles_post_ra>
// kernel: tpu_custom_call.1
= control target key start
LH: loop header
LB: loop body
LE: loop exit
PB: predicated region body
PF: predicated region fallthrough
CT: control target
= control target key end

     0   :  { %10 = vsyncpa [#allocation3], 0  ;;  %s553_s0 = inlined_call_operand.vmem [shape: bf16[32,128], index: 0, kind: input, shape index: {}]   ;;  %s554_s1 = inlined_call_operand.vmem [shape: bf16[64,32], index: 1, kind: input, shape index: {}]   ;;  %s555_s2 = inlined_call_operand.hbm [shape: bf16[128,128], index: 2, kind: input, shape index: {}]   ;;  %s556_s3 = inlined_call_operand.vmem [shape: f32[1,128], index: 3, kind: input, shape index: {}]   ;;  %s557_s4 = inlined_call_operand.vmem [shape: f32[32,128], index: 4, kind: input, shape index: {}]   ;;  %s558_s5 = inlined_call_operand.hbm [shape: f32[32,128], index: 5, kind: output, shape index: {}]  }
   0x1   :  { %11 = vsyncpa [#allocation4], 0  ;;  %s456_s18 = smov [#allocation2]   ;;  %s408_s22 = scalar_lea.hbm %s555_s2, 1024 }
   0x2   :  { %s21_s19 = sshll.u32 %s456_s18, 4  ;;  %p409_p0 = scmp.ne.s32.totalorder %s555_s2, %s408_s22  ;;  %s22_s19 = int_to_ptr.vmem [resolvable:$true] %s21_s19 }
   0x3   :  { %p412_p1 = scmp.lt.u32.totalorder %s408_s22, %s555_s2 }
   0x5   :  { %p414_p2 = pnand %p412_p1, %p409_p0 }
   0x7   :  { %417 = shalt.err (!%p414_p2)
}
   0x8   :  { %s418_s27 = scalar_lea.vmem %s22_s19, 1024  ;;  %p423_p4 = scmp.lt.s32.totalorder %s22_s19, %s22_s19 }
   0x9   :  { %p419_p3 = scmp.ne.s32.totalorder %s22_s19, %s418_s27  ;;  %p424_p5 = scmp.lt.s32.totalorder %s418_s27, %s418_s27 }
   0xb   :  { %p425_p6 = por %p424_p5, %p423_p4 }
   0xd   :  { %p426_p7 = pnand %p425_p6, %p419_p3 }
   0xf   :  { %429 = shalt.err (!%p426_p7)
}
  0x10   :  { %s457_s28 = smov 64   ;;  %s458_s29 = smov 4  }
  0x11   :  { %27 = dma.hbm_to_vmem [thread:$0]  %s555_s2, 1024, %s22_s19, [#allocation3], %s457_s28, %s457_s28, %s458_s29  }
  0x12   :  { %452 = dma.done.wait [#allocation3], 1024  }
  0x13   :  { %453 = vsyncadd [#allocation3], 4294966272  ;;  %v394_v0 = vld [vmem:[%s553_s0] sm:$0xff]   ;;  %v395_v1 = vld [vmem:[%s553_s0 + $0x8] sm:$0xff]   ;;  %vm80_vm0 = vcmask 261120   ;;  %s459_s25 = smov [#allocation5]  }
  0x14   :  { %356 = vmatprep.subr.bf16.mxu0 %v394_v0  ;;  %v396_v2 = vld [vmem:[%s554_s1] sm:$0xff]   ;;  %v397_v3 = vld [vmem:[%s554_s1 + $0x8] sm:$0xff]   ;;  %v398_v4 = vld [vmem:[%s554_s1 + $0x10] sm:$0xff]   ;;  %s309_s26 = sshll.u32 %s459_s25, 4  ;;  %s310_s26 = int_to_ptr.vmem [resolvable:$true] %s309_s26 }
  0x15   :  { %357 = vmatpush3.bf16.msra.mxu0 %v394_v0  ;;  %360 = vmatprep.mubr.msk.bf16.mxu0 %vm80_vm0, %v396_v2  ;;  %v400_v5 = vld [vmem:[#allocation2] sm:$0xff]   ;;  %v401_v6 = vld [vmem:[#allocation2 + $0x8] sm:$0xff]   ;;  %v402_v7 = vld [vmem:[#allocation2 + $0x10] sm:$0xff]   ;;  %s430_s27 = scalar_lea.vmem %s310_s26, 512  ;;  %p435_p9 = scmp.lt.s32.totalorder %s310_s26, %s310_s26 }
  0x16   :  { %358 = vmatprep.subr.bf16.mxu0 %v395_v1  ;;  %368 = vmatprep.subr.bf16.mxu1 %v400_v5  ;;  %v399_v8 = vld [vmem:[%s554_s1 + $0x18] sm:$0xff]   ;;  %v404_v10 = vld [vmem:[#allocation2 + $0x20] sm:$0xff]   ;;  %v405_v11 = vld [vmem:[#allocation2 + $0x28] sm:$0xff]   ;;  %p431_p8 = scmp.ne.s32.totalorder %s310_s26, %s430_s27  ;;  %p436_p10 = scmp.lt.s32.totalorder %s430_s27, %s430_s27 }
  0x17   :  { %369 = vmatpush3.bf16.msra.mxu1 %v400_v5  ;;  %v403_v9 = vld [vmem:[#allocation2 + $0x18] sm:$0xff]   ;;  %v406_v12 = vld [vmem:[#allocation2 + $0x30] sm:$0xff]   ;;  %v331_v24 = vld [vmem:[%s556_s3] ss:$0 sm:$0xff] }
  0x18   :  { %370 = vmatprep.subr.bf16.mxu1 %v401_v6  ;;  %v407_v13 = vld [vmem:[#allocation2 + $0x38] sm:$0xff]   ;;  %v290_v28 = vld [vmem:[%s557_s4 + $0x10] sm:$0xff]  ;;  %v288_v32 = vld [vmem:[%s557_s4] sm:$0xff]  ;;  %p437_p11 = por %p436_p10, %p435_p9 }
  0x19   :  { %359 = vmatpush3.bf16.msra.mxu0 %v395_v1  ;;  %v291_v36 = vld [vmem:[%s557_s4 + $0x18] sm:$0xff]  ;;  %v289_v40 = vld [vmem:[%s557_s4 + $0x8] sm:$0xff] }
  0x1a   :  { %p438_p12 = pnand %p437_p11, %p431_p8 }
  0x1b   :  { %371 = vmatpush3.bf16.msra.mxu1 %v401_v6 }
  0x1c   :  { %361 = vmatmul.mubr.msk.bf16.vlgmr.msra.gmra.mrb[0].mxu0 %vm80_vm0, %v397_v3  ;;  %372 = vmatprep.subr.bf16.mxu1 %v402_v7 }
  0x1d   :  { %364 = vmatprep.mubr.msk.bf16.mxu0 %vm80_vm0, %v398_v4 }
  0x1f   :  { %373 = vmatpush3.bf16.msra.mxu1 %v402_v7 }
  0x20   :  { %374 = vmatprep.subr.bf16.mxu1 %v403_v9 }
  0x23   :  { %375 = vmatpush3.bf16.msra.mxu1 %v403_v9 }
  0x24   :  { %365 = vmatmul.mubr.msk.bf16.gmra.mrb[4].mxu0 %vm80_vm0, %v399_v8  ;;  %376 = vmatprep.subr.bf16.mxu1 %v404_v10 }
  0x27   :  { %377 = vmatpush3.bf16.msra.mxu1 %v404_v10 }
  0x28   :  { %378 = vmatprep.subr.bf16.mxu1 %v405_v11 }
  0x2b   :  { %379 = vmatpush3.bf16.msra.mxu1 %v405_v11 }
  0x2c   :  { %380 = vmatprep.subr.bf16.mxu1 %v406_v12 }
  0x2f   :  { %381 = vmatpush3.bf16.msra.mxu1 %v406_v12 }
  0x30   :  { %382 = vmatprep.subr.bf16.mxu1 %v407_v13 }
  0x33   :  { %383 = vmatpush3.bf16.msra.mxu1 %v407_v13 }
  0xef   :  { %v362_v14 = vpop.f32.mrb[0].mxu0 }
  0xf0   :  { %v127_v15 = vpop.f32.mrb[1].mxu0  ;;  %v169_v25 = vmul.f32 %v362_v14, %v331_v24 }
  0xf1   :  { %v363_v16 = vpop.f32.mrb[2].mxu0  ;;  %v167_v26 = vmul.f32 %v331_v24, %v127_v15 }
  0xf2   :  { %v130_v17 = vpop.f32.mrb[3].mxu0  ;;  %v170_v29 = vmul.f32 %v363_v16, %v331_v24 }
  0xf3   :  { %v168_v33 = vmul.f32 %v331_v24, %v130_v17 }
  0xf7   :  { %v366_v18 = vpop.f32.mrb[4].mxu0 }
  0xf8   :  { %v143_v19 = vpop.f32.mrb[5].mxu0 }
  0xf9   :  { %v367_v20 = vpop.f32.mrb[6].mxu0 }
  0xfa   :  { %v159_v21 = vpack.c.bf16 %v367_v20, %v366_v18  ;;  %v146_v22 = vpop.f32.mrb[7].mxu0 }
  0xfb   :  { %v158_v23 = vpack.c.bf16 %v146_v22, %v143_v19 }
  0xfd   :  { %384 = vmatprep.mubr.bf16.mxu1 %v158_v23 }
  0xfe   :  { %385 = vmatmul.mubr.bf16.vlgmr.msra.gmra.mrb[0].mxu1 %v159_v21 }
 0x1d1   :  { %v386_v27 = vpop.f32.mrb[0].mxu1 }
 0x1d2   :  { %v286_v30 = vadd.f32 %v386_v27, %v169_v25  ;;  %v269_v31 = vpop.f32.mrb[1].mxu1 }
 0x1d3   :  { %v284_v34 = vadd.f32 %v269_v31, %v167_v26  ;;  %v387_v35 = vpop.f32.mrb[2].mxu1 }
 0x1d4   :  { %v294_v37 = vadd.f32 %v290_v28, %v286_v30  ;;  %v287_v38 = vadd.f32 %v387_v35, %v170_v29  ;;  %v272_v39 = vpop.f32.mrb[3].mxu1 }
 0x1d5   :  { %v292_v41 = vadd.f32 %v288_v32, %v284_v34  ;;  %v285_v42 = vadd.f32 %v272_v39, %v168_v33 }
 0x1d6   :  { %v298_v43 = vmax.f32 %v294_v37, 0.0  ;;  %v295_v44 = vadd.f32 %v291_v36, %v287_v38 }
 0x1d7   :  { %v296_v45 = vmax.f32 %v292_v41, 0.0  ;;  %v293_v46 = vadd.f32 %v289_v40, %v285_v42 }
 0x1d8   :  { %302 = vst [vmem:[#allocation5 + $0x10] sm:$0xff] %v298_v43  ;;  %v299_v47 = vmax.f32 %v295_v44, 0.0 }
 0x1d9   :  { %300 = vst [vmem:[#allocation5] sm:$0xff] %v296_v45  ;;  %v297_v48 = vmax.f32 %v293_v46, 0.0 }
 0x1da   :  { %303 = vst [vmem:[#allocation5 + $0x18] sm:$0xff] %v299_v47 }
 0x1db   :  { %301 = vst [vmem:[#allocation5 + $0x8] sm:$0xff] %v297_v48 }
 0x1dc   :  { %441 = shalt.err (!%p438_p12)
}
 0x1dd   :  { %s442_s29 = scalar_lea.hbm %s558_s5, 512 }
 0x1de   :  { %p443_p13 = scmp.ne.s32.totalorder %s558_s5, %s442_s29  ;;  %p446_p0 = scmp.lt.u32.totalorder %s442_s29, %s558_s5 }
 0x1e0   :  { %p448_p1 = pnand %p446_p0, %p443_p13 }
 0x1e2   :  { %451 = shalt.err (!%p448_p1)
}
 0x1e3   :  { %s460_s9 = smov 128   ;;  %s461_s10 = smov 8  }
 0x1e4   :  { %315 = dma.vmem_to_hbm [thread:$0]  %s310_s26, 512, %s558_s5, [#allocation4], %s460_s9, %s460_s9, %s461_s10  }
 0x1e5   :  { %454 = dma.done.wait [#allocation4], 512  }
 0x1e6   :  { %455 = vsyncadd [#allocation4], 4294966784 }
 0x1e7   :  { %319 = vsyncpa [#allocation3], 1 }
 0x1e8   :  { %320 = vsyncpa [#allocation4], 1 }

</bundles_post_ra>
